<compile_context>
chip_gen: v5e
topology: v5e:2x2
jax: 0.10.0
libtpu: 0.0.40
codegen_flags: <defaults>
</compile_context>

<pallas_src>
import functools

import jax
import jax.numpy as jnp
from jax.experimental import pallas as pl
from jax.experimental.pallas import tpu as pltpu

LANES = 128
ACC_ROWS = 8          # vreg-shaped accumulator / output block
CHUNK_ROWS = 512      # in-kernel accumulation chunk: (512, 128) f32 = 256 KiB
TILE_ROWS_MAX = 4096  # (4096, 128) f32 block = 2 MiB; safe within v5e default VMEM


def _round_up(x, m):
    return ((x + m - 1) // m) * m


def _sublane_multiple(dtype):
    # Second-minor block dim must be a multiple of 8 (f32) / 16 (bf16) / 32 (int8).
    bits = jnp.dtype(dtype).itemsize * 8
    return max(8, 256 // bits)


def _num_tensorcores():
    """Best-effort TensorCore-per-chip count (perf only; correctness never depends on it)."""
    try:
        kind = jax.devices()[0].device_kind.lower()
    except Exception:
        return 1
    if "v7" in kind:
        return 2          # v7x: 2 TCs per chip
    if "lite" in kind or "v5e" in kind or "v6" in kind:
        return 1          # v5e / v6e: 1 TC per chip
    if "v4" in kind or "v5" in kind:
        return 2          # v4 / v5p megacore
    return 1


def _bce_kernel(pred_ref, targ_ref, out_ref, *, rows, n_row_tiles,
                tiles_per_core, chunk, needs_mask, has_dup):
    c = pl.program_id(0)  # core-split axis (parallel)
    i = pl.program_id(1)  # reduction axis (arbitrary)
    tile_id = c * tiles_per_core + i

    tile_rows, lanes = pred_ref.shape
    num_chunks = tile_rows // chunk
    # Statically known number of valid rows in the last logical tile.
    last_valid = rows - (n_row_tiles - 1) * tile_rows

    # Output block index is constant along i -> block stays resident in VMEM
    # across the reduction axis and acts as the per-core accumulator.
    @pl.when(i == 0)
    def _init():
        out_ref[...] = jnp.zeros_like(out_ref)

    def accumulate_chunk(r0, row_limit):
        p = pred_ref[pl.ds(r0, chunk), :].astype(jnp.float32)
        t = targ_ref[pl.ds(r0, chunk), :].astype(jnp.float32)
        # PyTorch BCELoss clamps each log term at -100.
        log_p = jnp.maximum(jnp.log(p), -100.0)
        log_1mp = jnp.maximum(jnp.log1p(-p), -100.0)
        # -(t*log_p + (1-t)*log_1mp), rewritten with one fewer multiply.
        loss = -(log_1mp + t * (log_p - log_1mp))
        if row_limit is not None:
            # Masked path only: zero rows past the logical end. jnp.where is a
            # select, so NaN/Inf from undefined OOB block data never leaks in.
            ridx = r0 + jax.lax.broadcasted_iota(jnp.int32, (chunk, lanes), 0)
            loss = jnp.where(ridx < row_limit, loss, 0.0)
        # Vreg-aligned partial reduction: pure VPU adds into the (8,128) block.
        out_ref[...] += jnp.sum(
            loss.reshape(chunk // ACC_ROWS, ACC_ROWS, lanes), axis=0)

    def run_block(row_limit):
        if num_chunks == 1:
            accumulate_chunk(0, row_limit)
        else:
            def body(s, carry):
                accumulate_chunk(pl.multiple_of(s * chunk, chunk), row_limit)
                return carry
            jax.lax.fori_loop(0, num_chunks, body, 0)

    if not needs_mask and not has_dup:
        # Pure steady state: every block is full and unique -> no predicates,
        # no per-element mask ops on the hot path.
        run_block(None)
    else:
        @pl.when(tile_id < n_row_tiles - 1)
        def _steady():
            run_block(None)                       # unmasked interior blocks

        @pl.when(tile_id == n_row_tiles - 1)
        def _last():
            run_block(last_valid if needs_mask else None)  # masked ragged tail
        # tile_id >= n_row_tiles (clamped duplicate block on the 2nd core):
        # compute skipped entirely; only the zero-init above runs at i == 0.


@jax.jit
def bce_loss(pred, target):
    """Mean BCE over all elements. pred/target: same shape, pred in (0, 1)."""
    n = pred.size  # static under jit
    p_flat = pred.reshape(-1)
    t_flat = target.reshape(-1)

    n_aligned = (n // LANES) * LANES
    tail = n - n_aligned

    total = jnp.zeros((), jnp.float32)

    if n_aligned > 0:
        rows = n_aligned // LANES
        if tail:
            p_main = p_flat[:n_aligned]
            t_main = t_flat[:n_aligned]
        else:
            # Common case: reshape of a contiguous array is a bitcast, no copy.
            p_main, t_main = p_flat, t_flat
        p2 = p_main.reshape(rows, LANES)
        t2 = t_main.reshape(rows, LANES)

        sub = max(_sublane_multiple(pred.dtype), _sublane_multiple(target.dtype))
        if rows >= CHUNK_ROWS:
            tile_rows = min(TILE_ROWS_MAX, (rows // CHUNK_ROWS) * CHUNK_ROWS)
        else:
            tile_rows = _round_up(rows, sub)
        chunk = min(CHUNK_ROWS, tile_rows)      # tile_rows % chunk == 0 by construction

        n_row_tiles = pl.cdiv(rows, tile_rows)
        num_cores = _num_tensorcores() if n_row_tiles > 1 else 1
        tiles_per_core = pl.cdiv(n_row_tiles, num_cores)
        has_dup = num_cores * tiles_per_core > n_row_tiles
        needs_mask = (rows % tile_rows) != 0

        if has_dup:
            # Clamp so the (compute-skipped) duplicate trailing block of the
            # second core never indexes past the array.
            def idx_map(c, i):
                return (jnp.minimum(c * tiles_per_core + i, n_row_tiles - 1), 0)
        else:
            def idx_map(c, i):
                return (c * tiles_per_core + i, 0)

        kernel = functools.partial(
            _bce_kernel, rows=rows, n_row_tiles=n_row_tiles,
            tiles_per_core=tiles_per_core, chunk=chunk,
            needs_mask=needs_mask, has_dup=has_dup)

        partials = pl.pallas_call(
            kernel,
            out_shape=jax.ShapeDtypeStruct((num_cores * ACC_ROWS, LANES),
                                           jnp.float32),
            grid_spec=pltpu.PrefetchScalarGridSpec(
                num_scalar_prefetch=0,
                grid=(num_cores, tiles_per_core),
                in_specs=[
                    pl.BlockSpec((tile_rows, LANES), idx_map),
                    pl.BlockSpec((tile_rows, LANES), idx_map),
                ],
                # Lane-dense output; one (8,128) partial-sum block per core.
                out_specs=pl.BlockSpec((ACC_ROWS, LANES), lambda c, i: (c, 0)),
            ),
            compiler_params=pltpu.CompilerParams(
                # TODO(synk): on v7x verify "parallel" shards axis 0 across the
                # two TensorCores; if not, switch to pltpu.CORE_PARALLEL.
                dimension_semantics=("parallel", "arbitrary"),
            ),
        )(p2, t2)

        total = total + jnp.sum(partials)

    if tail:
        # <=127-element ragged tail folded in with plain jnp (no full-array pad).
        pt = p_flat[n_aligned:].astype(jnp.float32)
        tt = t_flat[n_aligned:].astype(jnp.float32)
        lp = jnp.maximum(jnp.log(pt), -100.0)
        l1p = jnp.maximum(jnp.log1p(-pt), -100.0)
        total = total + jnp.sum(-(l1p + tt * (lp - l1p)))

    return total / n


if __name__ == "__main__":
    key = jax.random.PRNGKey(0)
    k1, k2, k3, k4 = jax.random.split(key, 4)

    def ref_bce(p, t):
        lp = jnp.maximum(jnp.log(p), -100.0)
        l1p = jnp.maximum(jnp.log1p(-p), -100.0)
        return jnp.mean(-(t * lp + (1.0 - t) * l1p))

    # Shapes consistent with a segmentation-style forward: (N, C, H, W)
    pred = jax.nn.sigmoid(jax.random.normal(k1, (2, 4, 16, 16), dtype=jnp.float32))
    target = (jax.random.uniform(k2, (2, 4, 16, 16)) > 0.5).astype(jnp.float32)

    loss = bce_loss(pred, target)
    jax.block_until_ready(loss)
    assert jnp.allclose(loss, ref_bce(pred, target), rtol=1e-5, atol=1e-6), (
        loss, ref_bce(pred, target))

    # Ragged element count (210) exercising the aligned-prefix + jnp-tail path
    # and the in-kernel masked last block.
    pred2 = jax.nn.sigmoid(jax.random.normal(k3, (2, 3, 7, 5), dtype=jnp.float32))
    target2 = (jax.random.uniform(k4, (2, 3, 7, 5)) > 0.5).astype(jnp.float32)
    loss2 = bce_loss(pred2, target2)
    jax.block_until_ready(loss2)
    assert jnp.allclose(loss2, ref_bce(pred2, target2), rtol=1e-5, atol=1e-6), (
        loss2, ref_bce(pred2, target2))

    print("KERNEL_OK")
</pallas_src>

<mosaic_0001>
module attributes {stable_mosaic.version = 11 : i64} {
  func.func @_bce_kernel(%arg0: i32, %arg1: i32, %arg2: memref<16x128xf32, #tpu.memory_space<vmem>>, %arg3: memref<16x128xf32, #tpu.memory_space<vmem>>, %arg4: memref<8x128xf32, #tpu.memory_space<vmem>>) attributes {dimension_semantics = [#tpu.dimension_semantics<parallel>, #tpu.dimension_semantics<arbitrary>], iteration_bounds = array<i64: 1, 1>, scalar_prefetch = 0 : i64, scratch_operands = 0 : i64, tpu.core_type = #tpu.core_type<tc>, window_params = [{transform_indices = @transform_0, window_bounds = array<i64: 16, 128>}, {transform_indices = @transform_1, window_bounds = array<i64: 16, 128>}, {transform_indices = @transform_2, window_bounds = array<i64: 8, 128>}]} {
    %c0_i32 = arith.constant 0 : i32
    %0 = arith.cmpi eq, %arg1, %c0_i32 : i32
    %1 = arith.extui %0 : i1 to i32
    %c0_i32_0 = arith.constant 0 : i32
    %2 = arith.cmpi ne, %1, %c0_i32_0 : i32
    scf.if %2 {
      %cst_12 = arith.constant 0.000000e+00 : f32
      %23 = vector.broadcast %cst_12 : f32 to vector<8x128xf32>
      %c0_13 = arith.constant 0 : index
      %c0_14 = arith.constant 0 : index
      %24 = vector.load %arg4[%c0_13, %c0_14] : memref<8x128xf32, #tpu.memory_space<vmem>>, vector<8x128xf32>
      tpu.vector_store %arg4[%c0_13, %c0_14], %23 {strides = array<i32>} : memref<8x128xf32, #tpu.memory_space<vmem>>, vector<8x128xf32>,
    } else {
    }
    %c0 = arith.constant 0 : index
    %c0_1 = arith.constant 0 : index
    %3 = vector.load %arg2[%c0, %c0_1] : memref<16x128xf32, #tpu.memory_space<vmem>>, vector<16x128xf32>
    %c0_2 = arith.constant 0 : index
    %c0_3 = arith.constant 0 : index
    %4 = vector.load %arg3[%c0_2, %c0_3] : memref<16x128xf32, #tpu.memory_space<vmem>>, vector<16x128xf32>
    %5 = math.log %3 : vector<16x128xf32>
    %cst = arith.constant -1.000000e+02 : f32
    %6 = vector.broadcast %cst : f32 to vector<16x128xf32>
    %7 = arith.maximumf %5, %6 : vector<16x128xf32>
    %cst_4 = arith.constant 0.000000e+00 : f32
    %8 = vector.broadcast %cst_4 : f32 to vector<16x128xf32>
    %9 = arith.subf %8, %3 : vector<16x128xf32>
    %10 = math.log1p %9 : vector<16x128xf32>
    %cst_5 = arith.constant -1.000000e+02 : f32
    %11 = vector.broadcast %cst_5 : f32 to vector<16x128xf32>
    %12 = arith.maximumf %10, %11 : vector<16x128xf32>
    %13 = arith.subf %7, %12 : vector<16x128xf32>
    %14 = arith.mulf %4, %13 : vector<16x128xf32>
    %15 = arith.addf %12, %14 : vector<16x128xf32>
    %cst_6 = arith.constant 0.000000e+00 : f32
    %16 = vector.broadcast %cst_6 : f32 to vector<16x128xf32>
    %17 = arith.subf %16, %15 : vector<16x128xf32>
    %c0_7 = arith.constant 0 : index
    %c0_8 = arith.constant 0 : index
    %18 = vector.load %arg4[%c0_7, %c0_8] : memref<8x128xf32, #tpu.memory_space<vmem>>, vector<8x128xf32>
    %19 = vector.shape_cast %17 : vector<16x128xf32> to vector<2x8x128xf32>
    %cst_9 = arith.constant dense<0.000000e+00> : vector<8x128xf32>
    %20 = vector.multi_reduction <add>, %19, %cst_9 [0] : vector<2x8x128xf32> to vector<8x128xf32>
    %21 = arith.addf %18, %20 : vector<8x128xf32>
    %c0_10 = arith.constant 0 : index
    %c0_11 = arith.constant 0 : index
    %22 = vector.load %arg4[%c0_10, %c0_11] : memref<8x128xf32, #tpu.memory_space<vmem>>, vector<8x128xf32>
    tpu.vector_store %arg4[%c0_10, %c0_11], %21 {strides = array<i32>} : memref<8x128xf32, #tpu.memory_space<vmem>>, vector<8x128xf32>,
    return
  }
  func.func @transform_0(%arg0: i32, %arg1: i32) -> (i32, i32) {
    %c1_i32 = arith.constant 1 : i32
    %0 = arith.muli %arg0, %c1_i32 : i32
    %1 = arith.addi %0, %arg1 : i32
    %c0_i32 = arith.constant 0 : i32
    %c0_i32_0 = arith.constant 0 : i32
    return %1, %c0_i32 : i32, i32
  }
  func.func @transform_1(%arg0: i32, %arg1: i32) -> (i32, i32) {
    %c1_i32 = arith.constant 1 : i32
    %0 = arith.muli %arg0, %c1_i32 : i32
    %1 = arith.addi %0, %arg1 : i32
    %c0_i32 = arith.constant 0 : i32
    %c0_i32_0 = arith.constant 0 : i32
    return %1, %c0_i32 : i32, i32
  }
  func.func @transform_2(%arg0: i32, %arg1: i32) -> (i32, i32) {
    %c0_i32 = arith.constant 0 : i32
    %c0_i32_0 = arith.constant 0 : i32
    return %arg0, %c0_i32 : i32, i32
  }
}

</mosaic_0001>

<bundles_post_ra>
// kernel: bce_loss.1
= control target key start
LH: loop header
LB: loop body
LE: loop exit
PB: predicated region body
PF: predicated region fallthrough
CT: control target
= control target key end

     0   :  { %s159_s0 = inlined_call_operand.vmem [shape: f32[16,128], index: 0, kind: input, shape index: {}]   ;;  %s160_s1 = inlined_call_operand.vmem [shape: f32[16,128], index: 1, kind: input, shape index: {}]   ;;  %s161_s2 = inlined_call_operand.vmem [shape: f32[8,128], index: 2, kind: output, shape index: {}]  }
   0x1   :  { %v60_v0 = vld [vmem:[%s159_s0] sm:$0xff]  ;;  %v61_v1 = vld [vmem:[%s159_s0 + $0x8] sm:$0xff] }
   0x2   :  { %121 = vlog2.f32 %v60_v0  ;;  %v70_v2 = vsub.f32 0.0, %v60_v0  ;;  %v71_v3 = vsub.f32 0.0, %v61_v1  ;;  %v62_v27 = vld [vmem:[%s160_s1] sm:$0xff]  ;;  %v63_v29 = vld [vmem:[%s160_s1 + $0x8] sm:$0xff] }
   0x3   :  { %123 = vlog2.f32 %v61_v1 }
   0x4   :  { %v72_v4 = vadd.f32 1.0, %v70_v2  ;;  %v75_v5 = vmul.f32 -0.5, %v70_v2  ;;  %v81_v6 = vadd.f32 1.0, %v71_v3  ;;  %v84_v7 = vmul.f32 -0.5, %v71_v3 }
   0x5   :  { %v78_v10 = vand.u32 2147483647, %v70_v2  ;;  %v87_v13 = vand.u32 2147483647, %v71_v3 }
   0x6   :  { %125 = vlog2.f32 %v72_v4  ;;  %v76_v8 = vadd.f32 1.0, %v75_v5  ;;  %v85_v11 = vadd.f32 1.0, %v84_v7 }
   0x7   :  { %127 = vlog2.f32 %v81_v6  ;;  %vm79_vm0 = vcmp.lt.f32.partialorder %v78_v10, 0.0004427343  ;;  %vm88_vm1 = vcmp.lt.f32.partialorder %v87_v13, 0.0004427343 }
   0x8   :  { %v122_v9 = vpop.eup %121  ;;  %v77_v16 = vmul.f32 %v76_v8, %v70_v2  ;;  %v86_v18 = vmul.f32 %v85_v11, %v71_v3 }
   0x9   :  { %v124_v12 = vpop.eup %123  ;;  %v65_v14 = vmul.f32 0.6931472, %v122_v9 }
   0xa   :  { %v67_v15 = vmul.f32 0.6931472, %v124_v12 }
   0xb   :  { %v68_v21 = vmax.f32 %v65_v14, -100.0 }
   0xc   :  { %v126_v17 = vpop.eup %125  ;;  %v69_v23 = vmax.f32 %v67_v15, -100.0 }
   0xd   :  { %v128_v19 = vpop.eup %127  ;;  %v74_v20 = vmul.f32 0.6931472, %v126_v17 }
   0xe   :  { %v83_v22 = vmul.f32 0.6931472, %v128_v19 }
   0xf   :  { %v80_v24 = vsel %vm79_vm0, %v77_v16, %v74_v20 }
  0x10   :  { %v89_v25 = vsel %vm88_vm1, %v86_v18, %v83_v22  ;;  %v90_v26 = vmax.f32 %v80_v24, -100.0 }
  0x11   :  { %v91_v28 = vmax.f32 %v89_v25, -100.0 }
  0x12   :  { %v92_v30 = vsub.f32 %v68_v21, %v90_v26 }
  0x13   :  { %v93_v31 = vsub.f32 %v69_v23, %v91_v28 }
  0x14   :  { %v94_v32 = vmul.f32 %v92_v30, %v62_v27 }
  0x15   :  { %v95_v33 = vmul.f32 %v93_v31, %v63_v29 }
  0x16   :  { %v96_v34 = vadd.f32 %v94_v32, %v90_v26 }
  0x17   :  { %v97_v35 = vadd.f32 %v95_v33, %v91_v28 }
  0x18   :  { %v98_v36 = vsub.f32 0.0, %v96_v34 }
  0x19   :  { %v99_v37 = vsub.f32 0.0, %v97_v35 }
  0x1b   :  { %v101_v38 = vadd.f32 %v99_v37, %v98_v36 }
  0x1d   :  { %103 = vst [vmem:[%s161_s2] sm:$0xff] %v101_v38 }

</bundles_post_ra>
